<compile_context>
chip_gen: v5e
topology: v5e:2x2
jax: 0.10.0
libtpu: 0.0.40
codegen_flags: <defaults>
</compile_context>

<pallas_src>
import jax
import jax.numpy as jnp
from jax.experimental import pallas as pl
from jax.experimental.pallas import tpu as pltpu


# ---------------------------------------------------------------------------
# Problem sizes (small, consistent with the module's constructor).
# ---------------------------------------------------------------------------
BATCH = 256          # multiple of 128 -> dense lane tiles; 2 tiles for v7x
INPUT_DIM = 16       # "input_dim" (state dimension)
PARAM_DIM = 4        # "param_dim" (ODE parameters appended to the state)
N_UNITS = 32         # hidden width (module default is 90; kept small here)
N_LAYERS = 2         # -> 3 Linear layers total

FEAT_IN = INPUT_DIM + PARAM_DIM    # 20 (state incl. appended parameters)
FEAT_OUT = INPUT_DIM + PARAM_DIM   # output has the same width as y


def _round_up(x, m):
    return ((x + m - 1) // m) * m


# Common padded feature/hidden width (sublane axis); 32 for these sizes.
D_PAD = max(_round_up(FEAT_IN, 8), _round_up(N_UNITS, 8))

# bf16 dot operands (single-pass MXU on all generations); accumulation and all
# elementwise math stay f32.  Flip back to jnp.float32 for bit-tight checks.
WEIGHT_DTYPE = jnp.bfloat16

# Fused-integrator demo parameters.
NUM_STEPS = 16
DT = 0.05


def _elu(x):
    # ELU(alpha=1). exp(min(x,0)) avoids inf in the untaken branch; exp -> EUP.
    return jnp.where(x > 0, x, jnp.exp(jnp.minimum(x, 0.0)) - 1.0)


def _mlp_t(w_ref, b0, b1, b2, x):
    """3-layer MLP in feature-major layout.

    x: (D_PAD, tile) f32 with rows >= FEAT_IN exactly zero.
    w_ref: (3, D_PAD, D_PAD) WEIGHT_DTYPE slab of transposed, zero-padded
    weights; b0/b1/b2: (D_PAD, 1) f32 zero-padded bias columns (hoisted by the
    caller).  Returns (D_PAD, tile) f32 whose rows >= INPUT_DIM are exactly
    zero, which encodes torch.cat((net1(y), zeros), -1) with no extra work.
    """
    h = jnp.dot(w_ref[0], x.astype(WEIGHT_DTYPE),
                preferred_element_type=jnp.float32)
    h = _elu(h + b0)
    h = jnp.dot(w_ref[1], h.astype(WEIGHT_DTYPE),
                preferred_element_type=jnp.float32)
    h = _elu(h + b1)
    o = jnp.dot(w_ref[2], h.astype(WEIGHT_DTYPE),
                preferred_element_type=jnp.float32)
    return o + b2


# ---------------------------------------------------------------------------
# Kernels
# ---------------------------------------------------------------------------
def pnode_fwd_kernel(y_ref, w_ref, b_ref, out_ref):
    # Single call; bias "hoisting" is trivially the three loads below.
    o = _mlp_t(w_ref, b_ref[0], b_ref[1], b_ref[2],
               y_ref[...].astype(jnp.float32))
    # Dense 128-lane store of the full padded slab; the wrapper slices rows.
    out_ref[...] = o.astype(out_ref.dtype)


def pnode_rk4_kernel(y0_ref, w_ref, b_ref, yT_ref):
    # Hoist bias loads out of the 64 RHS evals (loop-invariant values).
    b0 = b_ref[0]
    b1 = b_ref[1]
    b2 = b_ref[2]

    def rhs(y):
        # Full padded width; rows >= INPUT_DIM of the result are exactly zero,
        # so the appended ODE-parameter rows (and padding rows) stay frozen.
        return _mlp_t(w_ref, b0, b1, b2, y)

    def step(_, y):
        k1 = rhs(y)
        k2 = rhs(y + (0.5 * DT) * k1)
        k3 = rhs(y + (0.5 * DT) * k2)
        k4 = rhs(y + DT * k3)
        return y + (DT / 6.0) * (k1 + 2.0 * k2 + 2.0 * k3 + k4)

    yT = jax.lax.fori_loop(0, NUM_STEPS, step,
                           y0_ref[...].astype(jnp.float32), unroll=2)
    yT_ref[...] = yT.astype(yT_ref.dtype)


# ---------------------------------------------------------------------------
# Wrappers
# ---------------------------------------------------------------------------
def _default_batch_tile(batch):
    """Single grid step on 1-TC chips (v5e/v6e); 2 parallel tiles on v7x."""
    try:
        kind = jax.devices()[0].device_kind.lower()
        n_tc = 2 if ("v7" in kind or "7x" in kind) else 1
    except Exception:  # pragma: no cover - be conservative off-TPU
        n_tc = 1
    if n_tc > 1 and batch % (128 * n_tc) == 0:
        return batch // n_tc
    return batch


def _to_feature_major(y):
    """(B, FEAT_IN) -> zero-padded (D_PAD, B) with batch on the lane axis."""
    B = y.shape[0]
    yt = jnp.zeros((D_PAD, B), jnp.float32)
    return yt.at[:FEAT_IN, :].set(y.T.astype(jnp.float32))


def _common_specs(batch_tile):
    in_specs = [
        pl.BlockSpec((D_PAD, batch_tile), lambda i: (0, i)),
        # Constant block index -> weights/biases stay resident in VMEM.
        pl.BlockSpec((3, D_PAD, D_PAD), lambda i: (0, 0, 0)),
        pl.BlockSpec((3, D_PAD, 1), lambda i: (0, 0, 0)),
    ]
    out_spec = pl.BlockSpec((D_PAD, batch_tile), lambda i: (0, i))
    return in_specs, out_spec


def pnode_forward(t, y, w_slab, b_slab, *, batch_tile=None):
    """Mirrors PNODE.forward(t, y). `t` is unused (as in PyTorch)."""
    del t
    B = y.shape[0]
    if batch_tile is None:
        batch_tile = _default_batch_tile(B)
    assert B % batch_tile == 0, "batch must be a multiple of the batch tile"
    in_specs, out_spec = _common_specs(batch_tile)
    out_t = pl.pallas_call(
        pnode_fwd_kernel,
        out_shape=jax.ShapeDtypeStruct((D_PAD, B), jnp.float32),
        grid=(B // batch_tile,),
        in_specs=in_specs,
        out_specs=out_spec,
        compiler_params=pltpu.CompilerParams(
            dimension_semantics=("parallel",)),
    )(_to_feature_major(y), w_slab, b_slab)
    # Rows 0..INPUT_DIM-1 = net1(y); rows INPUT_DIM..FEAT_OUT-1 are exact
    # zeros = torch.cat(..., zeros).  Slice + transpose in the wrapper.
    return out_t[:FEAT_OUT, :].T


def pnode_rk4_integrate(y0, w_slab, b_slab, *, batch_tile=None):
    """Fused fixed-step RK4: NUM_STEPS steps (4 RHS evals each, 64 total) in
    ONE pallas_call with the packed weights DMA'd to VMEM once."""
    B = y0.shape[0]
    if batch_tile is None:
        batch_tile = _default_batch_tile(B)
    assert B % batch_tile == 0
    in_specs, out_spec = _common_specs(batch_tile)
    yT_t = pl.pallas_call(
        pnode_rk4_kernel,
        out_shape=jax.ShapeDtypeStruct((D_PAD, B), jnp.float32),
        grid=(B // batch_tile,),
        in_specs=in_specs,
        out_specs=out_spec,
        compiler_params=pltpu.CompilerParams(
            dimension_semantics=("parallel",)),
    )(_to_feature_major(y0), w_slab, b_slab)
    return yT_t[:FEAT_IN, :].T


# ---------------------------------------------------------------------------
# Parameter init / packing / pure-JAX references
# ---------------------------------------------------------------------------
def init_params(key):
    """PyTorch nn.Linear default init: U(-1/sqrt(fan_in), 1/sqrt(fan_in))."""
    def linear(k, fan_in, fan_out):
        kw, kb = jax.random.split(k)
        bound = 1.0 / float(fan_in) ** 0.5
        w = jax.random.uniform(kw, (fan_in, fan_out), jnp.float32, -bound, bound)
        b = jax.random.uniform(kb, (fan_out,), jnp.float32, -bound, bound)
        return w, b

    k0, k1, k2 = jax.random.split(key, 3)
    w0, b0 = linear(k0, FEAT_IN, N_UNITS)
    w1, b1 = linear(k1, N_UNITS, N_UNITS)
    w2, b2 = linear(k2, N_UNITS, INPUT_DIM)
    return (w0, b0, w1, b1, w2, b2)


def pack_params(params):
    """Pack parameters into transposed, zero-padded slabs (done once).

    w_slab[l] = W_l^T padded to (D_PAD, D_PAD); b_slab[l] = bias as a
    (D_PAD, 1) column.  Zero padding keeps unused hidden/output rows exactly
    zero through the whole network.
    """
    w0, b0, w1, b1, w2, b2 = params
    w = jnp.zeros((3, D_PAD, D_PAD), jnp.float32)
    w = w.at[0, :N_UNITS, :FEAT_IN].set(w0.T)
    w = w.at[1, :N_UNITS, :N_UNITS].set(w1.T)
    w = w.at[2, :INPUT_DIM, :N_UNITS].set(w2.T)
    b = jnp.zeros((3, D_PAD, 1), jnp.float32)
    b = b.at[0, :N_UNITS, 0].set(b0)
    b = b.at[1, :N_UNITS, 0].set(b1)
    b = b.at[2, :INPUT_DIM, 0].set(b2)
    return w.astype(WEIGHT_DTYPE), b


def pnode_reference(t, y, params):
    """Pure-JAX reference for PNODE.forward (same bf16 operand casting as the
    kernel so the correctness check stays tight)."""
    del t
    w0, b0, w1, b1, w2, b2 = params

    def lin(x, w, b):
        return jnp.dot(x.astype(WEIGHT_DTYPE), w.astype(WEIGHT_DTYPE),
                       preferred_element_type=jnp.float32) + b

    h = _elu(lin(y, w0, b0))
    h = _elu(lin(h, w1, b1))
    net_out = lin(h, w2, b2)
    return jnp.concatenate([net_out, jnp.zeros_like(y[:, INPUT_DIM:])], axis=-1)


def rk4_reference(y0, params):
    def rhs(y):
        return pnode_reference(None, y, params)

    def step(_, y):
        k1 = rhs(y)
        k2 = rhs(y + (0.5 * DT) * k1)
        k3 = rhs(y + (0.5 * DT) * k2)
        k4 = rhs(y + DT * k3)
        return y + (DT / 6.0) * (k1 + 2.0 * k2 + 2.0 * k3 + k4)

    return jax.lax.fori_loop(0, NUM_STEPS, step, y0)


if __name__ == "__main__":
    key = jax.random.PRNGKey(0)
    k_params, k_y = jax.random.split(key)

    params = init_params(k_params)
    w_slab, b_slab = pack_params(params)               # one-time packing
    y = jax.random.normal(k_y, (BATCH, FEAT_IN), jnp.float32)
    t = jnp.float32(0.0)                               # unused, as in PyTorch

    # --- single forward (the module's forward(t, y)) ------------------------
    out = jax.block_until_ready(pnode_forward(t, y, w_slab, b_slab))
    ref = pnode_reference(t, y, params)
    assert out.shape == (BATCH, FEAT_OUT)
    # Tolerances account for bf16 operand rounding / summation-order effects.
    assert jnp.allclose(out, ref, atol=5e-3, rtol=5e-3), \
        "forward mismatch vs JAX reference"

    # --- fused multi-step RK4 (64 RHS evals in one pallas_call) -------------
    yT = jax.block_until_ready(pnode_rk4_integrate(y, w_slab, b_slab))
    yT_ref = jax.block_until_ready(rk4_reference(y, params))
    assert yT.shape == (BATCH, FEAT_IN)
    assert jnp.allclose(yT, yT_ref, atol=2e-2, rtol=2e-2), \
        "RK4 mismatch vs JAX reference"

    print("KERNEL_OK")
</pallas_src>

<mosaic_0001>
module attributes {stable_mosaic.version = 11 : i64} {
  func.func @pnode_fwd_kernel(%arg0: i32, %arg1: memref<32x256xf32, #tpu.memory_space<vmem>>, %arg2: memref<3x32x32xbf16, #tpu.memory_space<vmem>>, %arg3: memref<3x32x1xf32, #tpu.memory_space<vmem>>, %arg4: memref<32x256xf32, #tpu.memory_space<vmem>>) attributes {dimension_semantics = [#tpu.dimension_semantics<parallel>], iteration_bounds = array<i64: 1>, scalar_prefetch = 0 : i64, scratch_operands = 0 : i64, tpu.core_type = #tpu.core_type<tc>, window_params = [{transform_indices = @transform_0, window_bounds = array<i64: 32, 256>}, {pipeline_mode = #tpu.pipeline_mode<synchronous>, transform_indices = @transform_1, window_bounds = array<i64: 3, 32, 32>}, {pipeline_mode = #tpu.pipeline_mode<synchronous>, transform_indices = @transform_2, window_bounds = array<i64: 3, 32, 1>}, {transform_indices = @transform_3, window_bounds = array<i64: 32, 256>}]} {
    %c0 = arith.constant 0 : index
    %c0_0 = arith.constant 0 : index
    %c0_1 = arith.constant 0 : index
    %0 = vector.load %arg3[%c0, %c0_0, %c0_1] : memref<3x32x1xf32, #tpu.memory_space<vmem>>, vector<1x32x1xf32>
    %1 = vector.shape_cast %0 : vector<1x32x1xf32> to vector<32x1xf32>
    %c1 = arith.constant 1 : index
    %c0_2 = arith.constant 0 : index
    %c0_3 = arith.constant 0 : index
    %2 = vector.load %arg3[%c1, %c0_2, %c0_3] : memref<3x32x1xf32, #tpu.memory_space<vmem>>, vector<1x32x1xf32>
    %3 = vector.shape_cast %2 : vector<1x32x1xf32> to vector<32x1xf32>
    %c2 = arith.constant 2 : index
    %c0_4 = arith.constant 0 : index
    %c0_5 = arith.constant 0 : index
    %4 = vector.load %arg3[%c2, %c0_4, %c0_5] : memref<3x32x1xf32, #tpu.memory_space<vmem>>, vector<1x32x1xf32>
    %5 = vector.shape_cast %4 : vector<1x32x1xf32> to vector<32x1xf32>
    %c0_6 = arith.constant 0 : index
    %c0_7 = arith.constant 0 : index
    %6 = vector.load %arg1[%c0_6, %c0_7] : memref<32x256xf32, #tpu.memory_space<vmem>>, vector<32x256xf32>
    %c0_8 = arith.constant 0 : index
    %c0_9 = arith.constant 0 : index
    %c0_10 = arith.constant 0 : index
    %7 = vector.load %arg2[%c0_8, %c0_9, %c0_10] : memref<3x32x32xbf16, #tpu.memory_space<vmem>>, vector<1x32x32xbf16>
    %8 = vector.shape_cast %7 : vector<1x32x32xbf16> to vector<32x32xbf16>
    %9 = arith.truncf %6 : vector<32x256xf32> to vector<32x256xbf16>
    %cst = arith.constant dense<0.000000e+00> : vector<32x256xf32>
    %10 = tpu.matmul %8, %9, %cst {dimension_numbers = #tpu.dot_dimension_numbers<[1], [0], [0], [1], [0, 0, 1, 1], [], []>} : vector<32x32xbf16>, vector<32x256xbf16>, vector<32x256xf32> -> vector<32x256xf32>
    %11 = vector.broadcast %1 : vector<32x1xf32> to vector<32x256xf32>
    %12 = arith.addf %10, %11 : vector<32x256xf32>
    %cst_11 = arith.constant 0.000000e+00 : f32
    %13 = vector.broadcast %cst_11 : f32 to vector<32x256xf32>
    %14 = arith.cmpf ogt, %12, %13 : vector<32x256xf32>
    %cst_12 = arith.constant 0.000000e+00 : f32
    %15 = vector.broadcast %cst_12 : f32 to vector<32x256xf32>
    %16 = arith.minimumf %12, %15 : vector<32x256xf32>
    %17 = math.exp %16 : vector<32x256xf32>
    %cst_13 = arith.constant 1.000000e+00 : f32
    %18 = vector.broadcast %cst_13 : f32 to vector<32x256xf32>
    %19 = arith.subf %17, %18 : vector<32x256xf32>
    %20 = arith.select %14, %12, %19 : vector<32x256xi1>, vector<32x256xf32>
    %c1_14 = arith.constant 1 : index
    %c0_15 = arith.constant 0 : index
    %c0_16 = arith.constant 0 : index
    %21 = vector.load %arg2[%c1_14, %c0_15, %c0_16] : memref<3x32x32xbf16, #tpu.memory_space<vmem>>, vector<1x32x32xbf16>
    %22 = vector.shape_cast %21 : vector<1x32x32xbf16> to vector<32x32xbf16>
    %23 = arith.truncf %20 : vector<32x256xf32> to vector<32x256xbf16>
    %cst_17 = arith.constant dense<0.000000e+00> : vector<32x256xf32>
    %24 = tpu.matmul %22, %23, %cst_17 {dimension_numbers = #tpu.dot_dimension_numbers<[1], [0], [0], [1], [0, 0, 1, 1], [], []>} : vector<32x32xbf16>, vector<32x256xbf16>, vector<32x256xf32> -> vector<32x256xf32>
    %25 = vector.broadcast %3 : vector<32x1xf32> to vector<32x256xf32>
    %26 = arith.addf %24, %25 : vector<32x256xf32>
    %cst_18 = arith.constant 0.000000e+00 : f32
    %27 = vector.broadcast %cst_18 : f32 to vector<32x256xf32>
    %28 = arith.cmpf ogt, %26, %27 : vector<32x256xf32>
    %cst_19 = arith.constant 0.000000e+00 : f32
    %29 = vector.broadcast %cst_19 : f32 to vector<32x256xf32>
    %30 = arith.minimumf %26, %29 : vector<32x256xf32>
    %31 = math.exp %30 : vector<32x256xf32>
    %cst_20 = arith.constant 1.000000e+00 : f32
    %32 = vector.broadcast %cst_20 : f32 to vector<32x256xf32>
    %33 = arith.subf %31, %32 : vector<32x256xf32>
    %34 = arith.select %28, %26, %33 : vector<32x256xi1>, vector<32x256xf32>
    %c2_21 = arith.constant 2 : index
    %c0_22 = arith.constant 0 : index
    %c0_23 = arith.constant 0 : index
    %35 = vector.load %arg2[%c2_21, %c0_22, %c0_23] : memref<3x32x32xbf16, #tpu.memory_space<vmem>>, vector<1x32x32xbf16>
    %36 = vector.shape_cast %35 : vector<1x32x32xbf16> to vector<32x32xbf16>
    %37 = arith.truncf %34 : vector<32x256xf32> to vector<32x256xbf16>
    %cst_24 = arith.constant dense<0.000000e+00> : vector<32x256xf32>
    %38 = tpu.matmul %36, %37, %cst_24 {dimension_numbers = #tpu.dot_dimension_numbers<[1], [0], [0], [1], [0, 0, 1, 1], [], []>} : vector<32x32xbf16>, vector<32x256xbf16>, vector<32x256xf32> -> vector<32x256xf32>
    %39 = vector.broadcast %5 : vector<32x1xf32> to vector<32x256xf32>
    %40 = arith.addf %38, %39 : vector<32x256xf32>
    %c0_25 = arith.constant 0 : index
    %c0_26 = arith.constant 0 : index
    %41 = vector.load %arg4[%c0_25, %c0_26] : memref<32x256xf32, #tpu.memory_space<vmem>>, vector<32x256xf32>
    tpu.vector_store %arg4[%c0_25, %c0_26], %40 {strides = array<i32>} : memref<32x256xf32, #tpu.memory_space<vmem>>, vector<32x256xf32>,
    return
  }
  func.func @transform_0(%arg0: i32) -> (i32, i32) {
    %c0_i32 = arith.constant 0 : i32
    %c0_i32_0 = arith.constant 0 : i32
    return %c0_i32, %arg0 : i32, i32
  }
  func.func @transform_1(%arg0: i32) -> (i32, i32, i32) {
    %c0_i32 = arith.constant 0 : i32
    %c0_i32_0 = arith.constant 0 : i32
    %c0_i32_1 = arith.constant 0 : i32
    %c0_i32_2 = arith.constant 0 : i32
    return %c0_i32, %c0_i32_0, %c0_i32_1 : i32, i32, i32
  }
  func.func @transform_2(%arg0: i32) -> (i32, i32, i32) {
    %c0_i32 = arith.constant 0 : i32
    %c0_i32_0 = arith.constant 0 : i32
    %c0_i32_1 = arith.constant 0 : i32
    %c0_i32_2 = arith.constant 0 : i32
    return %c0_i32, %c0_i32_0, %c0_i32_1 : i32, i32, i32
  }
  func.func @transform_3(%arg0: i32) -> (i32, i32) {
    %c0_i32 = arith.constant 0 : i32
    %c0_i32_0 = arith.constant 0 : i32
    return %c0_i32, %arg0 : i32, i32
  }
}

</mosaic_0001>

<bundles_post_ra>
// kernel: tpu_custom_call.1
= control target key start
LH: loop header
LB: loop body
LE: loop exit
PB: predicated region body
PF: predicated region fallthrough
CT: control target
= control target key end

     0   :  { %8 = vsyncpa [#allocation3], 0  ;;  %s716_s0 = inlined_call_operand.vmem [shape: f32[32,256], index: 0, kind: input, shape index: {}]   ;;  %s717_s1 = inlined_call_operand.hbm [shape: bf16[3,32,32], index: 1, kind: input, shape index: {}]   ;;  %s718_s2 = inlined_call_operand.vmem [shape: f32[3,32,1], index: 2, kind: input, shape index: {}]   ;;  %s719_s3 = inlined_call_operand.hbm [shape: f32[32,256], index: 3, kind: output, shape index: {}]  }
   0x1   :  { %9 = vsyncpa [#allocation4], 0  ;;  %s16_s14 = sshll.u32 %s717_s1, 4  ;;  %s590_s15 = smov [#allocation2]   ;;  %s17_s14 = int_to_ptr.hbm [resolvable:$true] %s16_s14 }
   0x2   :  { %s18_s16 = sshll.u32 %s590_s15, 4  ;;  %s591_s17 = smov 64   ;;  %s19_s16 = int_to_ptr.vmem [resolvable:$true] %s18_s16 }
   0x3   :  { %s592_s18 = smov 4  }
   0x4   :  { %24 = dma.hbm_to_vmem [thread:$0]  %s17_s14, 768, %s19_s16, [#allocation3], %s591_s17, %s591_s17, %s592_s18  }
   0x5   :  { %586 = dma.done.wait [#allocation3], 768  }
   0x6   :  { %587 = vsyncadd [#allocation3], 4294966528  ;;  %v593_v0 = vmov 0   ;;  %v50_v1 = vld [vmem:[%s716_s0 + $0x20] sm:$0xff]  ;;  %v52_v2 = vld [vmem:[%s716_s0 + $0x30] sm:$0xff]  ;;  %vm92_vm0 = vcmask 261120  }
   0x7   :  { %503 = vset.pattern.permute.xlu0 %v593_v0  ;;  %504 = vset.pattern.permute.xlu1 %v593_v0  ;;  %v51_v3 = vld [vmem:[%s716_s0 + $0x28] sm:$0xff]  ;;  %v60_v4 = vpack.c.bf16 %v52_v2, %v50_v1  ;;  %v53_v5 = vld [vmem:[%s716_s0 + $0x38] sm:$0xff]  ;;  %v34_v6 = vld [vmem:[%s718_s2 + $0x10] sm:$0xff]  ;;  %s413_s5 = sshll.u32 %s719_s3, 4  ;;  %s595_s6 = smov 256   ;;  %s414_s5 = int_to_ptr.hbm [resolvable:$true] %s413_s5 }
   0x8   :  { %505 = vset.pattern.permute.xlu2 %v593_v0  ;;  %v46_v7 = vld [vmem:[%s716_s0] sm:$0xff]  ;;  %v61_v8 = vpack.c.bf16 %v53_v5, %v51_v3  ;;  %74 = vperm.xlu0 %503, %v34_v6   ;;  %v48_v9 = vld [vmem:[%s716_s0 + $0x10] sm:$0xff]  ;;  %v47_v10 = vld [vmem:[%s716_s0 + $0x8] sm:$0xff]  ;;  %s596_s7 = smov 16  }
   0x9   :  { %v49_v11 = vld [vmem:[%s716_s0 + $0x18] sm:$0xff]  ;;  %105 = vmatpush.bf16.msra.mxu0 %v60_v4  ;;  %492 = vmatpush.bf16.msra.mxu2 %v60_v4  ;;  %v58_v12 = vpack.c.bf16 %v48_v9, %v46_v7  ;;  %v32_v13 = vld [vmem:[%s718_s2] sm:$0xff]  ;;  %v487_v16 = vld [vmem:[#allocation2 + $0x8] sm:$0xff] }
   0xa   :  { %124 = vmatpush.bf16.msra.mxu1 %v61_v8  ;;  %494 = vmatpush.bf16.msra.mxu3 %v61_v8  ;;  %v59_v14 = vpack.c.bf16 %v49_v11, %v47_v10  ;;  %v486_v15 = vld [vmem:[#allocation2] sm:$0xff]  ;;  %v35_v17 = vld [vmem:[%s718_s2 + $0x18] sm:$0xff]  ;;  %v33_v18 = vld [vmem:[%s718_s2 + $0x8] sm:$0xff] }
   0xb   :  { %64 = vperm.xlu1 %504, %v32_v13   ;;  %v426_v19 = vld [vmem:[%s718_s2 + $0x20] sm:$0xff]  ;;  %v427_v20 = vld [vmem:[%s718_s2 + $0x28] sm:$0xff]  ;;  %v432_v22 = vld [vmem:[%s718_s2 + $0x50] sm:$0xff] }
   0xc   :  { %v431_v21 = vld [vmem:[%s718_s2 + $0x48] sm:$0xff]  ;;  %v428_v0 = vld [vmem:[%s718_s2 + $0x30] sm:$0xff] }
   0xd   :  { %106 = vmatpush.bf16.msra.mxu0 %v58_v12  ;;  %493 = vmatpush.bf16.msra.mxu2 %v58_v12 }
   0xe   :  { %125 = vmatpush.bf16.msra.mxu1 %v59_v14  ;;  %495 = vmatpush.bf16.msra.mxu3 %v59_v14 }
   0xf   :  { %206 = vperm.xlu2 %505, %v428_v0  }
  0x10   :  { %442 = vmatmul.msk.bf16.vlgmr.msra.gmra.mxu0 %vm92_vm0, %v486_v15  ;;  %443 = vmatmul.msk.bf16.vlgmr.msra.gmra.mxu2 %vm92_vm0, %v487_v16 }
  0x11   :  { %444 = vmatmul.msk.bf16.vlgmr.msra.gmra.mxu1 %vm92_vm0, %v486_v15  ;;  %445 = vmatmul.msk.bf16.vlgmr.msra.gmra.mxu3 %vm92_vm0, %v487_v16 }
  0x12   :  { %79 = vperm.xlu0 %503, %v35_v17   ;;  %v429_v17 = vld [vmem:[%s718_s2 + $0x38] sm:$0xff] }
  0x13   :  { %69 = vperm.xlu1 %504, %v33_v18  }
  0x17   :  { %211 = vperm.xlu2 %505, %v429_v17  }
  0x1a   :  { %196 = vperm.xlu0 %503, %v426_v19  }
  0x1b   :  { %201 = vperm.xlu1 %504, %v427_v20  }
  0x22   :  { %332 = vperm.xlu0 %503, %v431_v21  }
  0x23   :  { %337 = vperm.xlu1 %504, %v432_v22  }
  0x7a   :  { %v75_v27 = vpop.permute.xlu0 %74 }
  0x7d   :  { %v65_v23 = vpop.permute.xlu1 %64 }
  0x84   :  { %v80_v47 = vpop.permute.xlu0 %79 }
  0x85   :  { %v70_v33 = vpop.permute.xlu1 %69 }
  0x8d   :  { %v108_v24 = vpop.f32.mrf.mxu0 }
  0x8e   :  { %v127_v25 = vpop.f32.mrf.mxu1  ;;  %v672_v26 = vadd.f32 %v108_v24, %v65_v23 }
  0x8f   :  { %v674_v28 = vadd.f32 %v127_v25, %v65_v23  ;;  %v488_v25 = vld [vmem:[#allocation2 + $0x10] sm:$0xff] }
  0x90   :  { %v145_v30 = vmin.f32 %v672_v26, 0.0  ;;  %vm137_vm7 = vcmp.gt.f32.partialorder %v672_v26, 0.0 }
  0x91   :  { %v146_v34 = vmin.f32 %v674_v28, 0.0  ;;  %vm138_vm8 = vcmp.gt.f32.partialorder %v674_v28, 0.0 }
  0x92   :  { %v153_v42 = vmul.f32 1.442695, %v145_v30 }
  0x93   :  { %v113_v29 = vpop.f32.mrf.mxu2  ;;  %v155_v44 = vmul.f32 1.442695, %v146_v34 }
  0x94   :  { %v114_v31 = vadd.f32 %v113_v29, %v75_v27  ;;  %v132_v32 = vpop.f32.mrf.mxu3  ;;  %506 = vpow2.f32 %v153_v42  ;;  %v489_v29 = vld [vmem:[#allocation2 + $0x18] sm:$0xff] }
  0x95   :  { %v133_v35 = vadd.f32 %v132_v32, %v75_v27  ;;  %v110_v36 = vpop.f32.mrf.mxu0  ;;  %508 = vpow2.f32 %v155_v44  ;;  %v430_v27 = vld [vmem:[%s718_s2 + $0x40] sm:$0xff] }
  0x96   :  { %v149_v37 = vmin.f32 %v114_v31, 0.0  ;;  %v111_v38 = vadd.f32 %v110_v36, %v70_v33  ;;  %v129_v39 = vpop.f32.mrf.mxu1  ;;  %vm141_vm1 = vcmp.gt.f32.partialorder %v114_v31, 0.0  ;;  %327 = vperm.xlu2 %505, %v430_v27  }
  0x97   :  { %v150_v40 = vmin.f32 %v133_v35, 0.0  ;;  %v130_v41 = vadd.f32 %v129_v39, %v70_v33  ;;  %vm142_vm2 = vcmp.gt.f32.partialorder %v133_v35, 0.0  ;;  %v197_v33 = vpop.permute.xlu0 %196 }
  0x98   :  { %v147_v43 = vmin.f32 %v111_v38, 0.0  ;;  %v161_v46 = vmul.f32 1.442695, %v149_v37  ;;  %vm139_vm4 = vcmp.gt.f32.partialorder %v111_v38, 0.0  ;;  %v202_v37 = vpop.permute.xlu1 %201 }
  0x99   :  { %v148_v45 = vmin.f32 %v130_v41, 0.0  ;;  %v163_v48 = vmul.f32 1.442695, %v150_v40  ;;  %vm140_vm6 = vcmp.gt.f32.partialorder %v130_v41, 0.0 }
  0x9a   :  { %v157_v50 = vmul.f32 1.442695, %v147_v43  ;;  %510 = vpow2.f32 %v161_v46  ;;  %v507_v59 = vpop.eup %506 }
  0x9b   :  { %v115_v49 = vpop.f32.mrf.mxu2  ;;  %v159_v53 = vmul.f32 1.442695, %v148_v45  ;;  %512 = vpow2.f32 %v163_v48  ;;  %v509_v60 = vpop.eup %508  ;;  %v446_v12 = vadd.f32 -1.0, %v507_v59 }
  0x9c   :  { %v116_v51 = vadd.f32 %v115_v49, %v80_v47  ;;  %v134_v52 = vpop.f32.mrf.mxu3  ;;  %514 = vpow2.f32 %v157_v50  ;;  %v447_v16 = vadd.f32 -1.0, %v509_v60 }
  0x9d   :  { %v135_v54 = vadd.f32 %v134_v52, %v80_v47  ;;  %516 = vpow2.f32 %v159_v53  ;;  %v177_v21 = vsel %vm137_vm7, %v672_v26, %v446_v12  ;;  %v433_v26 = vld [vmem:[%s718_s2 + $0x58] sm:$0xff]  ;;  %s594_s2 = smov [#allocation5]  }
  0x9e   :  { %v151_v55 = vmin.f32 %v116_v51, 0.0  ;;  %vm143_vm3 = vcmp.gt.f32.partialorder %v116_v51, 0.0  ;;  %v178_v23 = vsel %vm138_vm8, %v674_v28, %v447_v16  ;;  %342 = vperm.xlu2 %505, %v433_v26   ;;  %s411_s29 = sshll.u32 %s594_s2, 4  ;;  %s412_s29 = int_to_ptr.vmem [resolvable:$true] %s411_s29 }
  0x9f   :  { %v152_v56 = vmin.f32 %v135_v54, 0.0  ;;  %vm144_vm5 = vcmp.gt.f32.partialorder %v135_v54, 0.0 }
  0xa0   :  { %v165_v57 = vmul.f32 1.442695, %v151_v55  ;;  %v511_v61 = vpop.eup %510 }
  0xa1   :  { %v167_v58 = vmul.f32 1.442695, %v152_v56  ;;  %v513_v62 = vpop.eup %512  ;;  %v450_v2 = vadd.f32 -1.0, %v511_v61 }
  0xa2   :  { %518 = vpow2.f32 %v165_v57  ;;  %v515_v63 = vpop.eup %514  ;;  %v451_v4 = vadd.f32 -1.0, %v513_v62 }
  0xa3   :  { %520 = vpow2.f32 %v167_v58  ;;  %v517_v1 = vpop.eup %516  ;;  %v448_v7 = vadd.f32 -1.0, %v515_v63  ;;  %v181_v10 = vsel %vm141_vm1, %v114_v31, %v450_v2 }
  0xa4   :  { %v449_v9 = vadd.f32 -1.0, %v517_v1  ;;  %v182_v14 = vsel %vm142_vm2, %v133_v35, %v451_v4  ;;  %v207_v35 = vpop.permute.xlu2 %206 }
  0xa5   :  { %v179_v19 = vsel %vm139_vm4, %v111_v38, %v448_v7 }
  0xa6   :  { %v180_v20 = vsel %vm140_vm6, %v130_v41, %v449_v9  ;;  %v190_v22 = vpack.c.bf16 %v179_v19, %v177_v21 }
  0xa7   :  { %v191_v24 = vpack.c.bf16 %v180_v20, %v178_v23 }
  0xa8   :  { %v519_v3 = vpop.eup %518 }
  0xa9   :  { %v521_v5 = vpop.eup %520  ;;  %v452_v6 = vadd.f32 -1.0, %v519_v3 }
  0xaa   :  { %v453_v8 = vadd.f32 -1.0, %v521_v5 }
  0xab   :  { %v183_v11 = vsel %vm143_vm3, %v116_v51, %v452_v6 }
  0xac   :  { %v192_v13 = vpack.c.bf16 %v183_v11, %v181_v10  ;;  %v184_v15 = vsel %vm144_vm5, %v135_v54, %v453_v8  ;;  %v212_v53 = vpop.permute.xlu2 %211 }
  0xad   :  { %v193_v18 = vpack.c.bf16 %v184_v15, %v182_v14 }
  0xae   :  { %236 = vmatpush.bf16.msrb.mxu2 %v192_v13 }
  0xaf   :  { %255 = vmatpush.bf16.msrb.mxu3 %v193_v18 }
  0xb2   :  { %237 = vmatpush.bf16.msrb.mxu2 %v190_v22 }
  0xb3   :  { %256 = vmatpush.bf16.msrb.mxu3 %v191_v24 }
  0xb5   :  { %462 = vmatmul.msk.bf16.vlgmr.msrb.gmra.mxu2 %vm92_vm0, %v488_v25 }
  0xb6   :  { %464 = vmatmul.msk.bf16.vlgmr.msrb.gmra.mxu3 %vm92_vm0, %v488_v25 }
  0xc5   :  { %463 = vmatmul.msk.bf16.gmra.mxu2 %vm92_vm0, %v489_v29 }
  0xc6   :  { %465 = vmatmul.msk.bf16.gmra.mxu3 %vm92_vm0, %v489_v29 }
 0x138   :  { %v239_v28 = vpop.f32.mrf.mxu2 }
 0x139   :  { %v258_v30 = vpop.f32.mrf.mxu3  ;;  %v698_v34 = vadd.f32 %v239_v28, %v197_v33  ;;  %v490_v28 = vld [vmem:[#allocation2 + $0x20] sm:$0xff] }
 0x13a   :  { %v700_v36 = vadd.f32 %v258_v30, %v197_v33  ;;  %v491_v30 = vld [vmem:[#allocation2 + $0x28] sm:$0xff] }
 0x13b   :  { %v276_v39 = vmin.f32 %v698_v34, 0.0  ;;  %vm268_vm15 = vcmp.gt.f32.partialorder %v698_v34, 0.0 }
 0x13c   :  { %v277_v43 = vmin.f32 %v700_v36, 0.0  ;;  %vm269_vm1 = vcmp.gt.f32.partialorder %v700_v36, 0.0 }
 0x13d   :  { %v284_v48 = vmul.f32 1.442695, %v276_v39 }
 0x13e   :  { %v286_v50 = vmul.f32 1.442695, %v277_v43 }
 0x13f   :  { %522 = vpow2.f32 %v284_v48 }
 0x140   :  { %v241_v31 = vpop.f32.mrf.mxu2  ;;  %524 = vpow2.f32 %v286_v50 }
 0x141   :  { %v260_v32 = vpop.f32.mrf.mxu3  ;;  %v242_v40 = vadd.f32 %v241_v31, %v202_v37  ;;  %v328_v31 = vpop.permute.xlu2 %327 }
 0x142   :  { %v261_v44 = vadd.f32 %v260_v32, %v202_v37 }
 0x143   :  { %v278_v49 = vmin.f32 %v242_v40, 0.0  ;;  %vm270_vm9 = vcmp.gt.f32.partialorder %v242_v40, 0.0 }
 0x144   :  { %v279_v51 = vmin.f32 %v261_v44, 0.0  ;;  %vm271_vm14 = vcmp.gt.f32.partialorder %v261_v44, 0.0 }
 0x145   :  { %v288_v56 = vmul.f32 1.442695, %v278_v49  ;;  %v523_v1 = vpop.eup %522 }
 0x146   :  { %v290_v59 = vmul.f32 1.442695, %v279_v51  ;;  %v525_v2 = vpop.eup %524  ;;  %v466_v12 = vadd.f32 -1.0, %v523_v1 }
 0x147   :  { %v467_v21 = vadd.f32 -1.0, %v525_v2 }
 0x148   :  { %v244_v38 = vpop.f32.mrf.mxu2  ;;  %v308_v25 = vsel %vm268_vm15, %v698_v34, %v466_v12 }
 0x149   :  { %v245_v41 = vadd.f32 %v244_v38, %v207_v35  ;;  %v263_v42 = vpop.f32.mrf.mxu3  ;;  %v309_v26 = vsel %vm269_vm1, %v700_v36, %v467_v21  ;;  %v333_v36 = vpop.permute.xlu0 %332 }
 0x14a   :  { %v264_v45 = vadd.f32 %v263_v42, %v207_v35 }
 0x14b   :  { %v280_v46 = vmin.f32 %v245_v41, 0.0  ;;  %vm272_vm10 = vcmp.gt.f32.partialorder %v245_v41, 0.0 }
 0x14c   :  { %v281_v47 = vmin.f32 %v264_v45, 0.0  ;;  %vm273_vm12 = vcmp.gt.f32.partialorder %v264_v45, 0.0 }
 0x14d   :  { %v292_v52 = vmul.f32 1.442695, %v280_v46  ;;  %v343_v46 = vpop.permute.xlu2 %342 }
 0x14e   :  { %v294_v54 = vmul.f32 1.442695, %v281_v47 }
 0x14f   :  { %526 = vpow2.f32 %v292_v52 }
 0x150   :  { %v246_v55 = vpop.f32.mrf.mxu2  ;;  %528 = vpow2.f32 %v294_v54 }
 0x151   :  { %v247_v57 = vadd.f32 %v246_v55, %v212_v53  ;;  %v265_v58 = vpop.f32.mrf.mxu3  ;;  %530 = vpow2.f32 %v288_v56 }
 0x152   :  { %v266_v60 = vadd.f32 %v265_v58, %v212_v53  ;;  %532 = vpow2.f32 %v290_v59 }
 0x153   :  { %v282_v61 = vmin.f32 %v247_v57, 0.0  ;;  %vm274_vm11 = vcmp.gt.f32.partialorder %v247_v57, 0.0 }
 0x154   :  { %v283_v62 = vmin.f32 %v266_v60, 0.0  ;;  %vm275_vm13 = vcmp.gt.f32.partialorder %v266_v60, 0.0 }
 0x155   :  { %v296_v63 = vmul.f32 1.442695, %v282_v61  ;;  %v527_v3 = vpop.eup %526 }
 0x156   :  { %v298_v0 = vmul.f32 1.442695, %v283_v62  ;;  %v529_v4 = vpop.eup %528  ;;  %v470_v7 = vadd.f32 -1.0, %v527_v3 }
 0x157   :  { %534 = vpow2.f32 %v296_v63  ;;  %v531_v5 = vpop.eup %530  ;;  %v471_v9 = vadd.f32 -1.0, %v529_v4 }
 0x158   :  { %536 = vpow2.f32 %v298_v0  ;;  %v533_v6 = vpop.eup %532  ;;  %v468_v13 = vadd.f32 -1.0, %v531_v5  ;;  %v312_v16 = vsel %vm272_vm10, %v245_v41, %v470_v7  ;;  %v338_v41 = vpop.permute.xlu1 %337 }
 0x159   :  { %v469_v15 = vadd.f32 -1.0, %v533_v6  ;;  %v313_v19 = vsel %vm273_vm12, %v264_v45, %v471_v9 }
 0x15a   :  { %v310_v23 = vsel %vm270_vm9, %v242_v40, %v468_v13 }
 0x15b   :  { %v311_v24 = vsel %vm271_vm14, %v261_v44, %v469_v15  ;;  %v321_v27 = vpack.c.bf16 %v310_v23, %v308_v25 }
 0x15c   :  { %v322_v29 = vpack.c.bf16 %v311_v24, %v309_v26 }
 0x15d   :  { %v535_v8 = vpop.eup %534 }
 0x15e   :  { %v537_v10 = vpop.eup %536  ;;  %v472_v11 = vadd.f32 -1.0, %v535_v8 }
 0x15f   :  { %v473_v14 = vadd.f32 -1.0, %v537_v10 }
 0x160   :  { %v314_v17 = vsel %vm274_vm11, %v247_v57, %v472_v11 }
 0x161   :  { %v323_v18 = vpack.c.bf16 %v314_v17, %v312_v16  ;;  %v315_v20 = vsel %vm275_vm13, %v266_v60, %v473_v14 }
 0x162   :  { %v324_v22 = vpack.c.bf16 %v315_v20, %v313_v19 }
 0x163   :  { %367 = vmatpush.bf16.msrb.mxu0 %v323_v18 }
 0x164   :  { %386 = vmatpush.bf16.msrb.mxu1 %v324_v22 }
 0x167   :  { %368 = vmatpush.bf16.msrb.mxu0 %v321_v27 }
 0x168   :  { %387 = vmatpush.bf16.msrb.mxu1 %v322_v29 }
 0x16a   :  { %482 = vmatmul.msk.bf16.vlgmr.msrb.gmra.mxu0 %vm92_vm0, %v490_v28 }
 0x16b   :  { %484 = vmatmul.msk.bf16.vlgmr.msrb.gmra.mxu1 %vm92_vm0, %v490_v28 }
 0x17a   :  { %483 = vmatmul.msk.bf16.gmra.mxu0 %vm92_vm0, %v491_v30 }
 0x17b   :  { %485 = vmatmul.msk.bf16.gmra.mxu1 %vm92_vm0, %v491_v30 }
 0x1e7   :  { %v370_v32 = vpop.f32.mrf.mxu0 }
 0x1e8   :  { %v371_v33 = vadd.f32 %v370_v32, %v328_v31  ;;  %v389_v34 = vpop.f32.mrf.mxu1 }
 0x1e9   :  { %v390_v35 = vadd.f32 %v389_v34, %v328_v31 }
 0x1ea   :  { %399 = vst [vmem:[#allocation5] sm:$0xff] %v371_v33 }
 0x1eb   :  { %400 = vst [vmem:[#allocation5 + $0x8] sm:$0xff] %v390_v35 }
 0x1ef   :  { %v372_v37 = vpop.f32.mrf.mxu0 }
 0x1f0   :  { %v373_v38 = vadd.f32 %v372_v37, %v333_v36  ;;  %v391_v39 = vpop.f32.mrf.mxu1 }
 0x1f1   :  { %v392_v40 = vadd.f32 %v391_v39, %v333_v36 }
 0x1f2   :  { %401 = vst [vmem:[#allocation5 + $0x10] sm:$0xff] %v373_v38 }
 0x1f3   :  { %402 = vst [vmem:[#allocation5 + $0x18] sm:$0xff] %v392_v40 }
 0x1f7   :  { %v375_v42 = vpop.f32.mrf.mxu0 }
 0x1f8   :  { %v376_v43 = vadd.f32 %v375_v42, %v338_v41  ;;  %v394_v44 = vpop.f32.mrf.mxu1 }
 0x1f9   :  { %v395_v45 = vadd.f32 %v394_v44, %v338_v41 }
 0x1fa   :  { %403 = vst [vmem:[#allocation5 + $0x20] sm:$0xff] %v376_v43 }
 0x1fb   :  { %404 = vst [vmem:[#allocation5 + $0x28] sm:$0xff] %v395_v45 }
 0x1ff   :  { %v377_v47 = vpop.f32.mrf.mxu0 }
 0x200   :  { %v378_v48 = vadd.f32 %v377_v47, %v343_v46  ;;  %v396_v49 = vpop.f32.mrf.mxu1 }
 0x201   :  { %v397_v50 = vadd.f32 %v396_v49, %v343_v46 }
 0x202   :  { %405 = vst [vmem:[#allocation5 + $0x30] sm:$0xff] %v378_v48 }
 0x203   :  { %406 = vst [vmem:[#allocation5 + $0x38] sm:$0xff] %v397_v50 }
 0x204   :  { %419 = dma.vmem_to_hbm [thread:$0]  %s412_s29, 1024, %s414_s5, [#allocation4], %s595_s6, %s595_s6, %s596_s7  }
 0x205   :  { %588 = dma.done.wait [#allocation4], 1024  }
 0x206   :  { %589 = vsyncadd [#allocation4], 4294966272 }
 0x207   :  { %424 = vsyncpa [#allocation3], 1 }
 0x208   :  { %425 = vsyncpa [#allocation4], 1 }

</bundles_post_ra>
